<compile_context>
chip_gen: v7x
topology: tpu7x:2x2x1
jax: 0.10.0
libtpu: 0.0.40
codegen_flags: <defaults>
</compile_context>

<pallas_src>
import math
import numpy as np
import jax
import jax.numpy as jnp
from jax import lax
from jax.experimental import pallas as pl
from jax.experimental.pallas import tpu as pltpu

_EPS = 1e-5
_LANE = 128
_SUB = 32  # batch-tile granularity (safe sublane multiple for f32/bf16)


# ------------------------------------------------------------------ helpers
def get_good_dims(in_dim: int, out_dim: int):
    """Mirror of AutoMLP.get_good_dims."""
    good_dims = [2 ** i for i in (range(1, 15) if in_dim < out_dim else range(15, 0, -1))]
    small_dim = min(in_dim, out_dim)
    large_dim = 2 * max(in_dim, out_dim)
    valid_dims = [d for d in good_dims if small_dim <= d <= large_dim]
    n = len(valid_dims)
    if n == 1:
        mid1 = mid2 = valid_dims[0]
    elif in_dim >= out_dim:
        mid1 = valid_dims[0]
        mid2 = valid_dims[1 + (n - 1) // 2]
    else:
        mid2 = valid_dims[-1]
        mid1 = valid_dims[(n - 1) // 2]
    return mid1, mid2


def xavier_uniform(key, in_dim, out_dim):
    """torch.nn.init.xavier_uniform_ for a Linear weight, stored as [in, out]."""
    bound = math.sqrt(6.0 / (in_dim + out_dim))
    return jax.random.uniform(key, (in_dim, out_dim), jnp.float32, -bound, bound)


def _round_up(a, b):
    return (a + b - 1) // b * b


def _pad2(a, rows, cols):
    return jnp.pad(a, ((0, rows - a.shape[0]), (0, cols - a.shape[1])))


def _device_kind() -> str:
    try:
        return jax.devices()[0].device_kind.lower()
    except Exception:
        return ""


def _is_megacore(kind: str) -> bool:
    # v7x has 2 TensorCores per chip; v5e/v6e are single-TC.
    return ("v7" in kind) or ("7x" in kind)


# ------------------------------------------------------------------ kernels
def _bn_scale_shift(st_ref, g_ref, b_ref, inv_n, eps):
    """Fold single-pass batch stats + affine into one per-feature scale/shift."""
    mu = st_ref[0:1, :] * inv_n                       # [1, F]
    ex2 = st_ref[1:2, :] * inv_n                      # [1, F]
    var = jnp.maximum(ex2 - mu * mu, 0.0)             # biased variance (PyTorch fwd)
    scale = g_ref[...] * lax.rsqrt(var + eps)
    shift = b_ref[...] - mu * scale
    return scale, shift


def _emit_stats(st_ref, h, accum_stats):
    """Emit per-feature (sum, sum of squares) of h as two rows (no zero-padding rows)."""
    rows = jnp.concatenate(
        [jnp.sum(h, axis=0, keepdims=True),
         jnp.sum(h * h, axis=0, keepdims=True)], axis=0)           # (2, F)
    if accum_stats:
        # single-TC path: in-kernel accumulator, constant block index, axis "arbitrary"
        @pl.when(pl.program_id(0) == 0)
        def _():
            st_ref[...] = jnp.zeros_like(st_ref)
        st_ref[...] += rows
    else:
        # megacore path: per-tile partials, reduced with one tiny jnp.sum outside
        st_ref[0] = rows


def _make_pass1_kernel(accum_stats):
    """Pass 1: stats of h1 = x @ W1 only (h1 itself never touches HBM)."""
    def kernel(x_ref, w1_ref, st_ref):
        # b1 intentionally omitted (cancelled by the following training-mode BN).
        # Padded x rows are exactly zero -> they contribute nothing to the stats.
        h = jnp.dot(x_ref[...], w1_ref[...], preferred_element_type=jnp.float32)
        _emit_stats(st_ref, h, accum_stats)
    return kernel


def _make_pass2_kernel(n_real, tile_n, need_mask, accum_stats, compute_dtype, eps=_EPS):
    """Pass 2: recompute h1, BN1 + ReLU, h2 = . @ W2, emit h2 + stats of h2."""
    inv_n = 1.0 / n_real

    def kernel(x_ref, w1_ref, w2_ref, g1_ref, be1_ref, st1_ref, h2_ref, st2_ref):
        scale, shift = _bn_scale_shift(st1_ref, g1_ref, be1_ref, inv_n, eps)
        h1 = jnp.dot(x_ref[...], w1_ref[...], preferred_element_type=jnp.float32)
        h = jnp.maximum(h1 * scale + shift, 0.0)
        if need_mask:
            # Zero out rows beyond the real batch so they do not pollute the h2 stats.
            # (Only emitted when n % tile_n != 0; minor VPU cost on non-last tiles.)
            row = pl.program_id(0) * tile_n + lax.broadcasted_iota(jnp.int32, (tile_n, 1), 0)
            h = jnp.where(row < n_real, h, 0.0)
        # b2 intentionally omitted (cancelled by the following training-mode BN).
        h2 = jnp.dot(h.astype(compute_dtype), w2_ref[...], preferred_element_type=jnp.float32)
        h2_ref[...] = h2.astype(h2_ref.dtype)
        _emit_stats(st2_ref, h2, accum_stats)
    return kernel


def _make_pass3_kernel(n_real, out_dim_real, last_norm, compute_dtype, eps=_EPS):
    """Pass 3: BN2 + ReLU, y = . @ W3 + b3, optional per-row LayerNorm."""
    inv_n = 1.0 / n_real
    inv_d = 1.0 / out_dim_real

    def kernel(h2_ref, w3_ref, b3_ref, g2_ref, be2_ref, lng_ref, lnb_ref, st2_ref, out_ref):
        scale, shift = _bn_scale_shift(st2_ref, g2_ref, be2_ref, inv_n, eps)
        h = jnp.maximum(h2_ref[...].astype(jnp.float32) * scale + shift, 0.0)
        y = jnp.dot(h.astype(compute_dtype), w3_ref[...],
                    preferred_element_type=jnp.float32) + b3_ref[...]
        if last_norm:
            # LayerNorm over the real features; padded columns of y are exactly 0
            # (W3/b3 padded with zeros), so summing all lanes / out_dim_real is exact.
            mu = jnp.sum(y, axis=-1, keepdims=True) * inv_d
            ex2 = jnp.sum(y * y, axis=-1, keepdims=True) * inv_d
            var = jnp.maximum(ex2 - mu * mu, 0.0)
            y = (y - mu) * lax.rsqrt(var + eps) * lng_ref[...] + lnb_ref[...]
        out_ref[...] = y.astype(out_ref.dtype)
    return kernel


# ------------------------------------------------------------------ wrapper
def automlp_forward(x, params, last_norm: bool, *,
                    compute_dtype=jnp.bfloat16,   # MXU-native; float32 for exact parity
                    tile_n=None,                  # None -> derive from VMEM budget
                    megacore_stats=None,          # None -> auto-detect (v7x => True)
                    vmem_limit_bytes=None):
    """x: [N, in_dim] f32.  params: dict from build_params (unpadded, PyTorch layout)."""
    n, in_dim = x.shape
    mid1 = params["w1"].shape[1]
    mid2 = params["w2"].shape[1]
    out_dim = params["w3"].shape[1]

    # lane-dense padding of every feature axis
    in_p = _round_up(in_dim, _LANE)
    m1_p = _round_up(mid1, _LANE)
    m2_p = _round_up(mid2, _LANE)
    out_p = _round_up(out_dim, _LANE)

    # ---- per-generation choices -------------------------------------------------
    kind = _device_kind()
    is_mega = _is_megacore(kind)
    if megacore_stats is None:
        megacore_stats = is_mega
    if vmem_limit_bytes is None:
        if is_mega:
            vmem_limit_bytes = 56 * 1024 * 1024      # v7x: 64 MiB physical per TC
        elif ("v5" in kind) or ("v6" in kind):
            vmem_limit_bytes = 100 * 1024 * 1024     # v5e/v6e: 128 MiB physical
        else:
            vmem_limit_bytes = 64 * 1024 * 1024      # conservative fallback

    cdt = compute_dtype
    cbytes = int(np.dtype(cdt).itemsize)
    f32 = jnp.float32

    # ---- batch tile derived from the VMEM budget ---------------------------------
    # resident (single-buffered) weights: pass 2 holds W1+W2, pass 3 holds W3
    resident_w = max((in_p * m1_p + m1_p * m2_p) * cbytes, m2_p * out_p * cbytes)
    # per-row streaming footprint (double-buffered row tiles + f32 compute temporaries)
    per_row = max(
        2 * (in_p + m2_p) * cbytes + 2 * m1_p * 4,   # pass 2 (usually the worst)
        2 * m2_p * cbytes + 3 * out_p * 4,           # pass 3
        2 * in_p * cbytes + m1_p * 4,                # pass 1
    )
    avail = vmem_limit_bytes - resident_w - (4 << 20)
    cap = max(avail // per_row, _SUB)
    cap = max((cap // _SUB) * _SUB, _SUB)

    n_sub = _round_up(n, _SUB)
    want = 1024 if tile_n is None else _round_up(max(int(tile_n), _SUB), _SUB)
    tn = min(want, cap, n_sub)
    if megacore_stats and n > _SUB:
        # keep nt >= 2 so the "parallel" batch axis splits across both TensorCores
        tn = min(tn, _round_up((n + 1) // 2, _SUB))
    tn = max(tn, _SUB)

    n_p = _round_up(n, tn)
    nt = n_p // tn
    need_mask = n_p != n

    # ---- padded, dtype-cast operands ---------------------------------------------
    xp = _pad2(x, n_p, in_p).astype(cdt)
    w1 = _pad2(params["w1"], in_p, m1_p).astype(cdt)
    w2 = _pad2(params["w2"], m1_p, m2_p).astype(cdt)
    w3 = _pad2(params["w3"], m2_p, out_p).astype(cdt)
    g1 = _pad2(params["g1"], 1, m1_p).astype(f32)
    be1 = _pad2(params["be1"], 1, m1_p).astype(f32)
    g2 = _pad2(params["g2"], 1, m2_p).astype(f32)
    be2 = _pad2(params["be2"], 1, m2_p).astype(f32)
    b3 = _pad2(params["b3"], 1, out_p).astype(f32)
    lng = _pad2(params["ln_g"], 1, out_p).astype(f32)
    lnb = _pad2(params["ln_b"], 1, out_p).astype(f32)
    # params["b1"] / params["b2"] are intentionally unused: constants added before
    # training-mode BatchNorm are cancelled exactly by the mean subtraction.

    cp_stats = pltpu.CompilerParams(
        dimension_semantics=("parallel",) if megacore_stats else ("arbitrary",),
        vmem_limit_bytes=int(vmem_limit_bytes))
    cp_par = pltpu.CompilerParams(
        dimension_semantics=("parallel",),
        vmem_limit_bytes=int(vmem_limit_bytes))

    def row_spec(d):                       # streaming tiles: default double-buffering
        return pl.BlockSpec((tn, d), lambda i: (i, 0))

    def const_spec(r, c):                  # grid-invariant: single-buffer (saves VMEM)
        return pl.BlockSpec((r, c), lambda i: (0, 0), pipeline_mode=pl.Buffered(1))

    def vec_spec(d):
        return const_spec(1, d)

    def stats_out(d):
        if megacore_stats:
            return (pl.BlockSpec((1, 2, d), lambda i: (i, 0, 0)),
                    jax.ShapeDtypeStruct((nt, 2, d), f32))
        return (pl.BlockSpec((2, d), lambda i: (0, 0)),
                jax.ShapeDtypeStruct((2, d), f32))

    accum = not megacore_stats

    # ---- pass 1: batch stats of h1 = x @ W1 (h1 stays in VMEM only) ---------------
    st1_spec, st1_shape = stats_out(m1_p)
    st1 = pl.pallas_call(
        _make_pass1_kernel(accum),
        grid=(nt,),
        in_specs=[row_spec(in_p), const_spec(in_p, m1_p)],
        out_specs=st1_spec,
        out_shape=st1_shape,
        compiler_params=cp_stats,
    )(xp, w1)
    if megacore_stats:
        st1 = jnp.sum(st1, axis=0)          # (2, m1_p)

    # ---- pass 2: recompute h1, BN1+ReLU, h2 = . @ W2 ; stats of h2 ----------------
    st2_spec, st2_shape = stats_out(m2_p)
    h2, st2 = pl.pallas_call(
        _make_pass2_kernel(n, tn, need_mask, accum, cdt),
        grid=(nt,),
        in_specs=[row_spec(in_p), const_spec(in_p, m1_p), const_spec(m1_p, m2_p),
                  vec_spec(m1_p), vec_spec(m1_p), const_spec(2, m1_p)],
        out_specs=(row_spec(m2_p), st2_spec),
        out_shape=(jax.ShapeDtypeStruct((n_p, m2_p), cdt), st2_shape),
        compiler_params=cp_stats,
    )(xp, w1, w2, g1, be1, st1)
    if megacore_stats:
        st2 = jnp.sum(st2, axis=0)          # (2, m2_p)

    # ---- pass 3: BN2+ReLU, y = . @ W3 + b3 ; optional per-row LayerNorm -----------
    y = pl.pallas_call(
        _make_pass3_kernel(n, out_dim, last_norm, cdt),
        grid=(nt,),
        in_specs=[row_spec(m2_p), const_spec(m2_p, out_p), vec_spec(out_p),
                  vec_spec(m2_p), vec_spec(m2_p), vec_spec(out_p), vec_spec(out_p),
                  const_spec(2, m2_p)],
        out_specs=row_spec(out_p),
        out_shape=jax.ShapeDtypeStruct((n_p, out_p), f32),
        compiler_params=cp_par,
    )(h2, w3, b3, g2, be2, lng, lnb, st2)

    return y[:n, :out_dim]


# ------------------------------------------------------------------ params
def build_params(key, in_dim, out_dim):
    mid1, mid2 = get_good_dims(in_dim, out_dim)
    k1, k2, k3 = jax.random.split(key, 3)
    params = {
        # Linear weights (xavier-uniform), biases zero (as in AutoMLP.init_weight)
        "w1": xavier_uniform(k1, in_dim, mid1),
        "b1": jnp.zeros((1, mid1), jnp.float32),   # no-op under training-mode BN
        "w2": xavier_uniform(k2, mid1, mid2),
        "b2": jnp.zeros((1, mid2), jnp.float32),   # no-op under training-mode BN
        "w3": xavier_uniform(k3, mid2, out_dim),
        "b3": jnp.zeros((1, out_dim), jnp.float32),
        # BatchNorm1d affine params (PyTorch default init: weight=1, bias=0)
        "g1": jnp.ones((1, mid1), jnp.float32),
        "be1": jnp.zeros((1, mid1), jnp.float32),
        "g2": jnp.ones((1, mid2), jnp.float32),
        "be2": jnp.zeros((1, mid2), jnp.float32),
        # LayerNorm affine params (default init: weight=1, bias=0)
        "ln_g": jnp.ones((1, out_dim), jnp.float32),
        "ln_b": jnp.zeros((1, out_dim), jnp.float32),
    }
    return params, (mid1, mid2)


# ------------------------------------------------------------------ reference
def automlp_ref(x, p, last_norm):
    eps = _EPS

    def bn(h, g, b):
        mu = h.mean(0, keepdims=True)
        var = ((h - mu) ** 2).mean(0, keepdims=True)
        return (h - mu) / jnp.sqrt(var + eps) * g + b

    h = x @ p["w1"] + p["b1"]
    h = jnp.maximum(bn(h, p["g1"], p["be1"]), 0.0)
    h = h @ p["w2"] + p["b2"]
    h = jnp.maximum(bn(h, p["g2"], p["be2"]), 0.0)
    h = h @ p["w3"] + p["b3"]
    if last_norm:
        mu = h.mean(-1, keepdims=True)
        var = ((h - mu) ** 2).mean(-1, keepdims=True)
        h = (h - mu) / jnp.sqrt(var + eps) * p["ln_g"] + p["ln_b"]
    return h


if __name__ == "__main__":
    in_dim, out_dim = 32, 8          # -> get_good_dims gives mid1=64, mid2=16
    batch = 1000                     # multiple batch tiles + padded-row masking

    key = jax.random.PRNGKey(0)
    kx, kp = jax.random.split(key)
    x = jax.random.normal(kx, (batch, in_dim), jnp.float32)
    params, (mid1, mid2) = build_params(kp, in_dim, out_dim)

    ref_ln = automlp_ref(x, params, True)
    ref_no = automlp_ref(x, params, False)

    # f32 path: tight check against the PyTorch-semantics reference.
    # Exercise BOTH stats schemes (in-kernel accumulator for single-TC chips and
    # per-tile partials + reduce for megacore chips) so either auto-selected path
    # is known-good on whatever generation this runs on.
    for megacore in (False, True):
        for last_norm, ref in ((True, ref_ln), (False, ref_no)):
            out = jax.block_until_ready(
                automlp_forward(x, params, last_norm,
                                compute_dtype=jnp.float32, tile_n=256,
                                megacore_stats=megacore))
            assert out.shape == (batch, out_dim)
            assert jnp.allclose(out, ref, atol=1e-4, rtol=1e-4), \
                float(jnp.max(jnp.abs(out - ref)))

    # Default path: auto (VMEM-derived) batch tile, auto stats scheme, bf16 MXU
    # inputs and bf16 h2 intermediate; normalization math stays f32.
    out_bf16 = jax.block_until_ready(automlp_forward(x, params, True))
    assert out_bf16.shape == (batch, out_dim)
    assert jnp.allclose(out_bf16, ref_ln, atol=1e-1, rtol=1e-1), \
        float(jnp.max(jnp.abs(out_bf16 - ref_ln)))

    print("KERNEL_OK")
</pallas_src>

<mosaic_0001>
module attributes {stable_mosaic.version = 11 : i64} {
  func.func @kernel(%arg0: i32, %arg1: memref<256x128xf32, #tpu.memory_space<vmem>>, %arg2: memref<128x128xf32, #tpu.memory_space<vmem>>, %arg3: memref<2x128xf32, #tpu.memory_space<vmem>>) attributes {dimension_semantics = [#tpu.dimension_semantics<arbitrary>], iteration_bounds = array<i64: 4>, scalar_prefetch = 0 : i64, scratch_operands = 0 : i64, tpu.core_type = #tpu.core_type<tc>, window_params = [{transform_indices = @transform_0, window_bounds = array<i64: 256, 128>}, {pipeline_mode = #tpu.pipeline_mode<synchronous>, transform_indices = @transform_1, window_bounds = array<i64: 128, 128>}, {pipeline_mode = #tpu.pipeline_mode<synchronous>, transform_indices = @transform_2, window_bounds = array<i64: 2, 128>}]} {
    %c0 = arith.constant 0 : index
    %c0_0 = arith.constant 0 : index
    %0 = vector.load %arg1[%c0, %c0_0] : memref<256x128xf32, #tpu.memory_space<vmem>>, vector<256x128xf32>
    %c0_1 = arith.constant 0 : index
    %c0_2 = arith.constant 0 : index
    %1 = vector.load %arg2[%c0_1, %c0_2] : memref<128x128xf32, #tpu.memory_space<vmem>>, vector<128x128xf32>
    %cst = arith.constant dense<0.000000e+00> : vector<256x128xf32>
    %2 = tpu.matmul %0, %1, %cst {dimension_numbers = #tpu.dot_dimension_numbers<[1], [0], [0], [1], [0, 0, 1, 1], [], []>} : vector<256x128xf32>, vector<128x128xf32>, vector<256x128xf32> -> vector<256x128xf32>
    %cst_3 = arith.constant dense<0.000000e+00> : vector<128xf32>
    %3 = vector.multi_reduction <add>, %2, %cst_3 [0] : vector<256x128xf32> to vector<128xf32>
    %4 = vector.shape_cast %3 : vector<128xf32> to vector<1x128xf32>
    %5 = arith.mulf %2, %2 : vector<256x128xf32>
    %cst_4 = arith.constant dense<0.000000e+00> : vector<128xf32>
    %6 = vector.multi_reduction <add>, %5, %cst_4 [0] : vector<256x128xf32> to vector<128xf32>
    %7 = vector.shape_cast %6 : vector<128xf32> to vector<1x128xf32>
    %8 = tpu.concatenate %4, %7 in 0 : vector<1x128xf32>, vector<1x128xf32> -> vector<2x128xf32>
    %c0_i32 = arith.constant 0 : i32
    %9 = arith.cmpi eq, %arg0, %c0_i32 : i32
    %10 = arith.extui %9 : i1 to i32
    %c0_i32_5 = arith.constant 0 : i32
    %11 = arith.cmpi ne, %10, %c0_i32_5 : i32
    scf.if %11 {
      %cst_10 = arith.constant 0.000000e+00 : f32
      %15 = vector.broadcast %cst_10 : f32 to vector<2x128xf32>
      %c0_11 = arith.constant 0 : index
      %c0_12 = arith.constant 0 : index
      %16 = vector.load %arg3[%c0_11, %c0_12] : memref<2x128xf32, #tpu.memory_space<vmem>>, vector<2x128xf32>
      tpu.vector_store %arg3[%c0_11, %c0_12], %15 {strides = array<i32>} : memref<2x128xf32, #tpu.memory_space<vmem>>, vector<2x128xf32>,
    } else {
    }
    %c0_6 = arith.constant 0 : index
    %c0_7 = arith.constant 0 : index
    %12 = vector.load %arg3[%c0_6, %c0_7] : memref<2x128xf32, #tpu.memory_space<vmem>>, vector<2x128xf32>
    %13 = arith.addf %12, %8 : vector<2x128xf32>
    %c0_8 = arith.constant 0 : index
    %c0_9 = arith.constant 0 : index
    %14 = vector.load %arg3[%c0_8, %c0_9] : memref<2x128xf32, #tpu.memory_space<vmem>>, vector<2x128xf32>
    tpu.vector_store %arg3[%c0_8, %c0_9], %13 {strides = array<i32>} : memref<2x128xf32, #tpu.memory_space<vmem>>, vector<2x128xf32>,
    return
  }
  func.func @transform_0(%arg0: i32) -> (i32, i32) {
    %c0_i32 = arith.constant 0 : i32
    %c0_i32_0 = arith.constant 0 : i32
    return %arg0, %c0_i32 : i32, i32
  }
  func.func @transform_1(%arg0: i32) -> (i32, i32) {
    %c0_i32 = arith.constant 0 : i32
    %c0_i32_0 = arith.constant 0 : i32
    %c0_i32_1 = arith.constant 0 : i32
    return %c0_i32, %c0_i32_0 : i32, i32
  }
  func.func @transform_2(%arg0: i32) -> (i32, i32) {
    %c0_i32 = arith.constant 0 : i32
    %c0_i32_0 = arith.constant 0 : i32
    %c0_i32_1 = arith.constant 0 : i32
    return %c0_i32, %c0_i32_0 : i32, i32
  }
}

</mosaic_0001>

<bundles_post_ra>
// kernel: tpu_custom_call.1
= control target key start
LH: loop header
LB: loop body
LE: loop exit
PB: predicated region body
PF: predicated region fallthrough
CT: control target
= control target key end

     0   :  { %7 = vsyncpa [#allocation3], 0  ;;  %s1276_s0 = inlined_call_operand.hbm [shape: f32[1024,128], index: 0, kind: input, shape index: {}]   ;;  %s1277_s1 = inlined_call_operand.hbm [shape: f32[128,128], index: 1, kind: input, shape index: {}]   ;;  %s1278_s2 = inlined_call_operand.hbm [shape: f32[2,128], index: 2, kind: output, shape index: {}]  }
   0x1   :  { %9 = vsyncpa [#allocation3 + $0x1], 0 }
   0x2   :  { %10 = vsyncpa [#allocation6], 0 }
   0x3   :  { %11 = vsyncpa [#allocation4], 0  ;;  %s1023_s9 = smov 0   ;;  %s1025_s10 = smov 0  }
   0x4   :  { %s1027_s11 = smov 0   ;;  %s1029_s12 = smov 0  }
   0x5 LB: > { %s1042_s13 = sadd.s32 4294967295, %s1000_s12   ;;  %p37_p0 = scmp.ne.s32.totalorder %s992_s10, %s988_s9  ;;  %s1000_s12 = sphi %s1029_s12, %s1294_s12   ;;  %s996_s11 = sphi %s1027_s11, %s1293_s11   ;;  %s992_s10 = sphi %s1025_s10, %s1292_s10   ;;  %s988_s9 = sphi %s1023_s9, %s1291_s9  }
   0x6   : > { %p1279_p1 = scmp.eq.s32.totalorder %s1042_s13, 0  ;;  %p623_p2 = scmp.ge.s32.totalorder %s1000_s12, 1 }
   0x7   : > { %p90_p3 = scmp.lt.s32.totalorder %s1000_s12, 5  ;;  %s1002_s16 = smov [#allocation5]  }
   0x8   : > { %p1051_p5 = por %p1279_p1, %p37_p0  ;;  %s102_s17 = sshll.u32 %s1002_s16, 4  ;;  %s103_s17 = int_to_ptr.vmem [resolvable:$true] %s102_s17 }
   0x9   : > { %p1055_p6 = pnand %p623_p2, %p90_p3  ;;  %s1068_s19 = sadd.s32 1, %s1000_s12  }
   0xa   : > { %s1282_s14 = scalar_select %p1051_p5, 1, 0 }
   0xb   : > { %s1283_s15 = scalar_select %p1055_p6, 1, 0 }
   0xc   : > { %p824_p7 = pneg %p1055_p6  ;;  %s24_s20 = sadd.s32 1, %s996_s11 }
   0xd   : > { %s21_s21 = ssub.s32 %s1000_s12, %s1068_s19  ;;  %s874_s24 = scalar_lea.hbm %s1277_s1, 2048 }
   0xe   : > { %p1063_p8 = pnand %p824_p7, %p1279_p1  ;;  %p875_p9 = scmp.ne.s32.totalorder %s1277_s1, %s874_s24 }
   0xf   : > { %p881_p13 = scmp.lt.u32.totalorder %s874_s24, %s1277_s1 }
  0x10   : > { %p876_p10 = pneg %p1063_p8 }
  0x12   : > { %p877_p11 = pnand %p876_p10, %p875_p9 }
  0x14   : > { %p878_p12 = pneg %p877_p11 }
  0x16   : > { %p883_p0 = pnand %p881_p13, %p878_p12 }
  0x18   : > { %886 = shalt.err (!%p883_p0)
}
  0x19   : > { %s887_s29 = scalar_lea.vmem %s103_s17, 2048  ;;  %p895_p4 = scmp.lt.s32.totalorder %s103_s17, %s103_s17 }
  0x1a   : > { %p888_p2 = scmp.ne.s32.totalorder %s103_s17, %s887_s29  ;;  %p896_p1 = scmp.lt.s32.totalorder %s887_s29, %s887_s29 }
  0x1c   : > { %p890_p3 = pnand %p888_p2, %p876_p10  ;;  %p897_p5 = por %p896_p1, %p895_p4 }
  0x1e   : > { %p891_p7 = pneg %p890_p3 }
  0x20   : > { %p898_p6 = pnand %p897_p5, %p891_p7 }
  0x22   : > { %901 = shalt.err (!%p898_p6)
}
  0x23   : > { %s1003_s30 = smov 128   ;;  %s1004_s3 = smov 8  }
  0x24   : > { %827 = dma.hbm_to_vmem [thread:$0]  (!%p1063_p8), %s1277_s1, 2048, %s103_s17, [#allocation6], %s1003_s30, %s1003_s30, %s1004_s3  }
  0x25   : > { %p22_p1 = scmp.eq.s32.totalorder %s21_s21, 0  ;;  %p31_p4 = scmp.ne.s32.totalorder %s996_s11, %s992_s10 }
  0x26   : > { %p32_p5 = scmp.eq.s32.totalorder %s1000_s12, 0  ;;  %p833_p6 = scmp.lt.s32.totalorder %s1000_s12, 4 }
  0x27   : > { %s1097_s6 = scalar_select %p22_p1, %s996_s11, %s24_s20  }
  0x28   : > { %p33_p9 = por %p32_p5, %p31_p4  ;;  %s116_s7 = sand.u32 1, %s996_s11  }
  0x29   : > { %s626_s8 = sshll.u32 %s116_s7, 8  ;;  %s637_s9 = sshll.u32 %s1000_s12, 12 }
  0x2a   : > { %s1104_s18 = scalar_lea.hbm %s1276_s0, %s637_s9  ;;  %s120_s17 = scalar_lea.vmem [#allocation2], %s626_s8 }
  0x2b   : > { %s127_s21 = sshll.u32 %s120_s17, 4  ;;  %p1108_p8 = pnand %p833_p6, %p33_p9  ;;  %s1106_s21 = int_to_ptr.vmem [resolvable:$true] %s127_s21 }
  0x2c   : > { %s1112_s12 = scalar_lea.sflag [#allocation3], %s116_s7  ;;  %s902_s23 = scalar_lea.hbm %s1104_s18, 4096 }
  0x2d   : > { %p903_p10 = scmp.ne.s32.totalorder %s1104_s18, %s902_s23  ;;  %p904_p11 = pneg %p1108_p8 }
  0x2e   : > { %s907_s26 = scalar_lea.hbm %s1276_s0, 16384  ;;  %p908_p0 = scmp.lt.u32.totalorder %s1104_s18, %s1276_s0 }
  0x2f   : > { %p905_p12 = pnand %p904_p11, %p903_p10  ;;  %p909_p2 = scmp.lt.u32.totalorder %s907_s26, %s902_s23 }
  0x30   : > { %p911_p7 = scmp.lt.u32.totalorder %s902_s23, %s1104_s18 }
  0x31   : > { %p906_p13 = pneg %p905_p12  ;;  %p910_p3 = por %p909_p2, %p908_p0 }
  0x33   : > { %p912_p1 = por %p911_p7, %p910_p3 }
  0x35   : > { %p913_p4 = pnand %p912_p1, %p906_p13 }
  0x37   : > { %916 = shalt.err (!%p913_p4)
}
  0x38   : > { %s917_s29 = scalar_lea.vmem %s1106_s21, 4096  ;;  %s1005_s4 = smov [#allocation2]  }
  0x39   : > { %p918_p5 = scmp.ne.s32.totalorder %s1106_s21, %s917_s29  ;;  %s922_s5 = sshll.u32 %s1005_s4, 4  ;;  %s923_s5 = int_to_ptr.vmem [resolvable:$false] %s922_s5 }
  0x3a   : > { %s924_s7 = scalar_lea.vmem %s923_s5, 8192  ;;  %p925_p10 = scmp.lt.s32.totalorder %s1106_s21, %s923_s5 }
  0x3b   : > { %p920_p6 = pnand %p918_p5, %p904_p11  ;;  %p926_p12 = scmp.lt.s32.totalorder %s924_s7, %s917_s29 }
  0x3d   : > { %p921_p9 = pneg %p920_p6  ;;  %p927_p0 = por %p926_p12, %p925_p10 }
  0x3f   : > { %p928_p2 = pnand %p927_p0, %p921_p9 }
  0x41   : > { %931 = shalt.err (!%p928_p2)
}
  0x42   : > { %831 = dma.hbm_to_vmem [thread:$0]  (!%p1108_p8), %s1104_s18, 4096, %s1106_s21, %s1112_s12, %s1003_s30, %s1003_s30, %s1004_s3  }
  0x43   : > { %p1286_p11 = scmp.ne.s32.totalorder %s1283_s15, 0 }
  0x44   : > { %s141_s8 = sand.u32 (!%p1286_p11), 1, %s992_s10   ;;  %p1287_p13 = scmp.ne.s32.totalorder (!%p1286_p11), %s1282_s14, 0 }
  0x45   : > { %139 = sbr.rel (%p1286_p11) target bundleno = 432 (0x1b0), region = 28  ;;  %s630_s9 = sshll.u32 (!%p1286_p11), %s141_s8, 8 }
  0x46   : > { %s142_s16 = scalar_lea.sflag (!%p1286_p11), [#allocation3], %s141_s8  ;;  %s1146_s22 = scalar_lea.vmem (!%p1286_p11), [#allocation2], %s630_s9 }
  0x4c   : > { %975 = dma.done.wait (%p1287_p13), %s142_s16, 4096  }
  0x4d   : > { %977 = vsyncadd (%p1287_p13), %s142_s16, 4294963200  ;;  %p1288_p3 = scmp.eq.s32.totalorder %s1042_s13, 0 }
  0x4f   : > { %979 = dma.done.wait (%p1288_p3), [#allocation6], 2048   ;;  %p1289_p8 = pmov %p1288_p3 }
  0x50   : > { %v198_v0 = vld [vmem:[#allocation5] sm:$0xff]  ;;  %v199_v1 = vld [vmem:[#allocation5 + $0x8] sm:$0xff]  ;;  %v200_v2 = vld [vmem:[#allocation5 + $0x10] sm:$0xff]  ;;  %vm545_vm0 = vcmask 1040384   ;;  %p1290_p7 = scmp.ne.s32.totalorder %s1042_s13, 0 }
  0x51   : > { %981 = vsyncadd (%p1289_p8), [#allocation6], 4294965248  ;;  %v766_v3 = vpack.c.bf16 %v199_v1, %v198_v0  ;;  %v201_v4 = vld [vmem:[#allocation5 + $0x18] sm:$0xff]  ;;  %v202_v6 = vld [vmem:[#allocation5 + $0x20] sm:$0xff] }
  0x52   : > { %v770_v5 = vpack.c.bf16 %v201_v4, %v200_v2  ;;  %v203_v7 = vld [vmem:[#allocation5 + $0x28] sm:$0xff]  ;;  %v166_v9 = vld [vmem:[%s1146_s22] sm:$0xff]  ;;  %v204_v10 = vld [vmem:[#allocation5 + $0x30] sm:$0xff] }
  0x53   : > { %767 = vmatprep.subr.bf16.mxu0 %v766_v3  ;;  %798 = vmatprep.subr.bf16.mxu1 %v766_v3  ;;  %v774_v8 = vpack.c.bf16 %v203_v7, %v202_v6  ;;  %v205_v11 = vld [vmem:[#allocation5 + $0x38] sm:$0xff]  ;;  %v206_v13 = vld [vmem:[#allocation5 + $0x40] sm:$0xff]  ;;  %v207_v14 = vld [vmem:[#allocation5 + $0x48] sm:$0xff] }
  0x54   : > { %769 = vmatpush3.bf16.msra.mxu0 %v766_v3  ;;  %806 = vmatpush3.bf16.msra.mxu1 %v766_v3  ;;  %v778_v12 = vpack.c.bf16 %v205_v11, %v204_v10  ;;  %v182_v15 = vld [vmem:[%s1146_s22 + $0x80] sm:$0xff]  ;;  %v782_v16 = vpack.c.bf16 %v207_v14, %v206_v13  ;;  %v208_v17 = vld [vmem:[#allocation5 + $0x50] sm:$0xff]  ;;  %v209_v18 = vld [vmem:[#allocation5 + $0x58] sm:$0xff] }
  0x55   : > { %771 = vmatprep.subr.bf16.mxu0 %v770_v5  ;;  %799 = vmatprep.subr.bf16.mxu1 %v770_v5  ;;  %v786_v19 = vpack.c.bf16 %v209_v18, %v208_v17  ;;  %v210_v20 = vld [vmem:[#allocation5 + $0x60] sm:$0xff]  ;;  %v211_v21 = vld [vmem:[#allocation5 + $0x68] sm:$0xff]  ;;  %v212_v23 = vld [vmem:[#allocation5 + $0x70] sm:$0xff] }
  0x56   : > { %718 = vmatprep.mubr.f32.mxu0 %v166_v9  ;;  %742 = vmatprep.mubr.f32.mxu1 %v182_v15  ;;  %v790_v22 = vpack.c.bf16 %v211_v21, %v210_v20  ;;  %v213_v24 = vld [vmem:[#allocation5 + $0x78] sm:$0xff]  ;;  %v167_v26 = vld [vmem:[%s1146_s22 + $0x8] sm:$0xff]  ;;  %v168_v28 = vld [vmem:[%s1146_s22 + $0x10] sm:$0xff] }
  0x57   : > { %v794_v25 = vpack.c.bf16 %v213_v24, %v212_v23  ;;  %v183_v27 = vld [vmem:[%s1146_s22 + $0x88] sm:$0xff]  ;;  %v184_v29 = vld [vmem:[%s1146_s22 + $0x90] sm:$0xff]  ;;  %v169_v30 = vld [vmem:[%s1146_s22 + $0x18] sm:$0xff] }
  0x58   : > { %773 = vmatpush3.bf16.msra.mxu0 %v770_v5  ;;  %807 = vmatpush3.bf16.msra.mxu1 %v770_v5  ;;  %v185_v31 = vld [vmem:[%s1146_s22 + $0x98] sm:$0xff]  ;;  %v170_v32 = vld [vmem:[%s1146_s22 + $0x20] sm:$0xff]  ;;  %v171_v34 = vld [vmem:[%s1146_s22 + $0x28] sm:$0xff] }
  0x59   : > { %775 = vmatprep.subr.bf16.mxu0 %v774_v8  ;;  %800 = vmatprep.subr.bf16.mxu1 %v774_v8  ;;  %v186_v33 = vld [vmem:[%s1146_s22 + $0xa0] sm:$0xff]  ;;  %v187_v35 = vld [vmem:[%s1146_s22 + $0xa8] sm:$0xff]  ;;  %v172_v36 = vld [vmem:[%s1146_s22 + $0x30] sm:$0xff] }
  0x5a   : > { %v188_v37 = vld [vmem:[%s1146_s22 + $0xb0] sm:$0xff]  ;;  %v173_v38 = vld [vmem:[%s1146_s22 + $0x38] sm:$0xff]  ;;  %v174_v40 = vld [vmem:[%s1146_s22 + $0x40] sm:$0xff] }
  0x5b   : > { %v189_v39 = vld [vmem:[%s1146_s22 + $0xb8] sm:$0xff]  ;;  %v190_v41 = vld [vmem:[%s1146_s22 + $0xc0] sm:$0xff]  ;;  %v175_v42 = vld [vmem:[%s1146_s22 + $0x48] sm:$0xff] }
  0x5c   : > { %777 = vmatpush3.bf16.msra.mxu0 %v774_v8  ;;  %808 = vmatpush3.bf16.msra.mxu1 %v774_v8  ;;  %v191_v43 = vld [vmem:[%s1146_s22 + $0xc8] sm:$0xff]  ;;  %v176_v44 = vld [vmem:[%s1146_s22 + $0x50] sm:$0xff]  ;;  %v177_v46 = vld [vmem:[%s1146_s22 + $0x58] sm:$0xff] }
  0x5d   : > { %779 = vmatprep.subr.bf16.mxu0 %v778_v12  ;;  %801 = vmatprep.subr.bf16.mxu1 %v778_v12  ;;  %v192_v45 = vld [vmem:[%s1146_s22 + $0xd0] sm:$0xff]  ;;  %v193_v47 = vld [vmem:[%s1146_s22 + $0xd8] sm:$0xff]  ;;  %v178_v48 = vld [vmem:[%s1146_s22 + $0x60] sm:$0xff] }
  0x5e   : > { %v194_v49 = vld [vmem:[%s1146_s22 + $0xe0] sm:$0xff]  ;;  %v179_v50 = vld [vmem:[%s1146_s22 + $0x68] sm:$0xff]  ;;  %v180_v52 = vld [vmem:[%s1146_s22 + $0x70] sm:$0xff] }
  0x5f   : > { %v195_v51 = vld [vmem:[%s1146_s22 + $0xe8] sm:$0xff]  ;;  %v196_v53 = vld [vmem:[%s1146_s22 + $0xf0] sm:$0xff]  ;;  %v181_v54 = vld [vmem:[%s1146_s22 + $0x78] sm:$0xff] }
  0x60   : > { %781 = vmatpush3.bf16.msra.mxu0 %v778_v12  ;;  %809 = vmatpush3.bf16.msra.mxu1 %v778_v12  ;;  %v197_v55 = vld [vmem:[%s1146_s22 + $0xf8] sm:$0xff] }
  0x61   : > { %783 = vmatprep.subr.bf16.mxu0 %v782_v16  ;;  %802 = vmatprep.subr.bf16.mxu1 %v782_v16 }
  0x64   : > { %785 = vmatpush3.bf16.msra.mxu0 %v782_v16  ;;  %810 = vmatpush3.bf16.msra.mxu1 %v782_v16 }
  0x65   : > { %787 = vmatprep.subr.bf16.mxu0 %v786_v19  ;;  %803 = vmatprep.subr.bf16.mxu1 %v786_v19 }
  0x68   : > { %789 = vmatpush3.bf16.msra.mxu0 %v786_v19  ;;  %811 = vmatpush3.bf16.msra.mxu1 %v786_v19 }
  0x69   : > { %791 = vmatprep.subr.bf16.mxu0 %v790_v22  ;;  %804 = vmatprep.subr.bf16.mxu1 %v790_v22 }
  0x6c   : > { %793 = vmatpush3.bf16.msra.mxu0 %v790_v22  ;;  %812 = vmatpush3.bf16.msra.mxu1 %v790_v22 }
  0x6d   : > { %795 = vmatprep.subr.bf16.mxu0 %v794_v25  ;;  %805 = vmatprep.subr.bf16.mxu1 %v794_v25 }
  0x70   : > { %797 = vmatpush3.bf16.msra.mxu0 %v794_v25  ;;  %813 = vmatpush3.bf16.msra.mxu1 %v794_v25 }
  0x73   : > { %719 = vmatmul.mubr.f32.vlgmr.msra.gmra.mrb[0].mxu0 %v167_v26  ;;  %743 = vmatmul.mubr.f32.vlgmr.msra.gmra.mrb[0].mxu1 %v183_v27 }
  0x74   : > { %721 = vmatprep.mubr.f32.mxu0 %v168_v28  ;;  %745 = vmatprep.mubr.f32.mxu1 %v184_v29 }
  0x77   : > { %722 = vmatmul.mubr.f32.gmra.mrb[2].mxu0 %v169_v30  ;;  %746 = vmatmul.mubr.f32.gmra.mrb[2].mxu1 %v185_v31 }
  0x78   : > { %724 = vmatprep.mubr.f32.mxu0 %v170_v32  ;;  %748 = vmatprep.mubr.f32.mxu1 %v186_v33 }
  0x7b   : > { %725 = vmatmul.mubr.f32.gmra.mrb[4].mxu0 %v171_v34  ;;  %749 = vmatmul.mubr.f32.gmra.mrb[4].mxu1 %v187_v35 }
  0x7c   : > { %727 = vmatprep.mubr.f32.mxu0 %v172_v36  ;;  %751 = vmatprep.mubr.f32.mxu1 %v188_v37 }
  0x7f   : > { %728 = vmatmul.mubr.f32.gmra.mrb[6].mxu0 %v173_v38  ;;  %752 = vmatmul.mubr.f32.gmra.mrb[6].mxu1 %v189_v39 }
  0x80   : > { %730 = vmatprep.mubr.f32.mxu0 %v174_v40  ;;  %754 = vmatprep.mubr.f32.mxu1 %v190_v41 }
  0x83   : > { %731 = vmatmul.mubr.f32.gmra.mrb[8].mxu0 %v175_v42  ;;  %755 = vmatmul.mubr.f32.gmra.mrb[8].mxu1 %v191_v43 }
  0x84   : > { %733 = vmatprep.mubr.f32.mxu0 %v176_v44  ;;  %757 = vmatprep.mubr.f32.mxu1 %v192_v45 }
  0x87   : > { %734 = vmatmul.mubr.f32.gmra.mrb[10].mxu0 %v177_v46  ;;  %758 = vmatmul.mubr.f32.gmra.mrb[10].mxu1 %v193_v47 }
  0x88   : > { %736 = vmatprep.mubr.f32.mxu0 %v178_v48  ;;  %760 = vmatprep.mubr.f32.mxu1 %v194_v49 }
  0x8b   : > { %737 = vmatmul.mubr.f32.gmra.mrb[12].mxu0 %v179_v50  ;;  %761 = vmatmul.mubr.f32.gmra.mrb[12].mxu1 %v195_v51 }
  0x8c   : > { %739 = vmatprep.mubr.f32.mxu0 %v180_v52  ;;  %763 = vmatprep.mubr.f32.mxu1 %v196_v53 }
  0x8f   : > { %740 = vmatmul.mubr.f32.gmra.mrb[14].mxu0 %v181_v54  ;;  %764 = vmatmul.mubr.f32.gmra.mrb[14].mxu1 %v197_v55 }
 0x146   : > { %v720_v56 = vpop.f32.mrb[0].mxu0  ;;  %v1188_v57 = vpop.f32.mrb[0].mxu1 }
 0x147   : > { %v477_v58 = vmul.f32 %v720_v56, %v720_v56  ;;  %v280_v59 = vpop.f32.mrb[1].mxu0  ;;  %v1190_v60 = vpop.f32.mrb[1].mxu1 }
 0x148   : > { %v439_v61 = vadd.f32 %v720_v56, %v280_v59  ;;  %v476_v62 = vmul.f32 %v280_v59, %v280_v59 }
 0x14a   : > { %v508_v63 = vadd.f32 %v477_v58, %v476_v62  ;;  %v723_v0 = vpop.f32.mrb[2].mxu0  ;;  %v1192_v1 = vpop.f32.mrb[2].mxu1 }
 0x14b   : > { %v290_v2 = vpop.f32.mrb[3].mxu0  ;;  %v1194_v3 = vpop.f32.mrb[3].mxu1  ;;  %v479_v6 = vmul.f32 %v723_v0, %v723_v0 }
 0x14c   : > { %v440_v4 = vadd.f32 %v439_v61, %v290_v2  ;;  %v478_v5 = vmul.f32 %v290_v2, %v290_v2 }
 0x14e   : > { %v509_v7 = vadd.f32 %v508_v63, %v478_v5  ;;  %v726_v8 = vpop.f32.mrb[4].mxu0  ;;  %v441_v9 = vadd.f32 %v723_v0, %v440_v4  ;;  %v1196_v10 = vpop.f32.mrb[4].mxu1 }
 0x14f   : > { %v300_v11 = vpop.f32.mrb[5].mxu0  ;;  %v1198_v12 = vpop.f32.mrb[5].mxu1  ;;  %v481_v16 = vmul.f32 %v726_v8, %v726_v8 }
 0x150   : > { %v442_v13 = vadd.f32 %v441_v9, %v300_v11  ;;  %v480_v14 = vmul.f32 %v300_v11, %v300_v11  ;;  %v510_v15 = vadd.f32 %v509_v7, %v479_v6  ;;  %v492_v9 = vmul.f32 %v1190_v60, %v1190_v60 }
 0x152   : > { %v511_v17 = vadd.f32 %v510_v15, %v480_v14  ;;  %v729_v18 = vpop.f32.mrb[6].mxu0  ;;  %v443_v19 = vadd.f32 %v726_v8, %v442_v13  ;;  %v1200_v20 = vpop.f32.mrb[6].mxu1  ;;  %v493_v14 = vmul.f32 %v1188_v57, %v1188_v57 }
 0x153   : > { %v310_v21 = vpop.f32.mrb[7].mxu0  ;;  %v1202_v22 = vpop.f32.mrb[7].mxu1  ;;  %v483_v26 = vmul.f32 %v729_v18, %v729_v18 }
 0x154   : > { %v444_v23 = vadd.f32 %v443_v19, %v310_v21  ;;  %v482_v24 = vmul.f32 %v310_v21, %v310_v21  ;;  %v512_v25 = vadd.f32 %v511_v17, %v481_v16  ;;  %v494_v17 = vmul.f32 %v1194_v3, %v1194_v3 }
 0x155   : > { %v495_v21 = vmul.f32 %v1192_v1, %v1192_v1 }
 0x156   : > { %v513_v27 = vadd.f32 %v512_v25, %v482_v24  ;;  %v732_v28 = vpop.f32.mrb[8].mxu0  ;;  %v445_v29 = vadd.f32 %v729_v18, %v444_v23  ;;  %v1204_v30 = vpop.f32.mrb[8].mxu1 }
 0x157   : > { %v320_v31 = vpop.f32.mrb[9].mxu0  ;;  %v400_v32 = vpop.f32.mrb[9].mxu1  ;;  %v485_v36 = vmul.f32 %v732_v28, %v732_v28 }
 0x158   : > { %v446_v33 = vadd.f32 %v445_v29, %v320_v31  ;;  %v484_v34 = vmul.f32 %v320_v31, %v320_v31  ;;  %v514_v35 = vadd.f32 %v513_v27, %v483_v26 }
 0x15a   : > { %v515_v37 = vadd.f32 %v514_v35, %v484_v34  ;;  %v735_v38 = vpop.f32.mrb[10].mxu0  ;;  %v447_v39 = vadd.f32 %v732_v28, %v446_v33  ;;  %v1206_v40 = vpop.f32.mrb[10].mxu1 }
 0x15b   : > { %v330_v41 = vpop.f32.mrb[11].mxu0  ;;  %v410_v42 = vpop.f32.mrb[11].mxu1  ;;  %v487_v46 = vmul.f32 %v735_v38, %v735_v38 }
 0x15c   : > { %v448_v43 = vadd.f32 %v447_v39, %v330_v41  ;;  %v486_v44 = vmul.f32 %v330_v41, %v330_v41  ;;  %v516_v45 = vadd.f32 %v515_v37, %v485_v36  ;;  %v501_v37 = vmul.f32 %v1204_v30, %v1204_v30 }
 0x15d   : > { %v502_v39 = vmul.f32 %v410_v42, %v410_v42 }
 0x15e   : > { %v517_v47 = vadd.f32 %v516_v45, %v486_v44  ;;  %v738_v48 = vpop.f32.mrb[12].mxu0  ;;  %v449_v49 = vadd.f32 %v735_v38, %v448_v43  ;;  %v762_v50 = vpop.f32.mrb[12].mxu1 }
 0x15f   : > { %v340_v51 = vpop.f32.mrb[13].mxu0  ;;  %v420_v52 = vpop.f32.mrb[13].mxu1  ;;  %v489_v56 = vmul.f32 %v738_v48, %v738_v48 }
 0x160   : > { %v450_v53 = vadd.f32 %v449_v49, %v340_v51  ;;  %v488_v54 = vmul.f32 %v340_v51, %v340_v51  ;;  %v518_v55 = vadd.f32 %v517_v47, %v487_v46  ;;  %v504_v46 = vmul.f32 %v420_v52, %v420_v52 }
 0x162   : > { %v519_v58 = vadd.f32 %v518_v55, %v488_v54  ;;  %v741_v59 = vpop.f32.mrb[14].mxu0  ;;  %v451_v61 = vadd.f32 %v738_v48, %v450_v53  ;;  %v765_v62 = vpop.f32.mrb[14].mxu1 }
 0x163   : > { %v350_v63 = vpop.f32.mrb[15].mxu0  ;;  %v430_v0 = vpop.f32.mrb[15].mxu1  ;;  %v491_v6 = vmul.f32 %v741_v59, %v741_v59  ;;  %v507_v55 = vmul.f32 %v765_v62, %v765_v62 }
 0x164   : > { %v452_v2 = vadd.f32 %v451_v61, %v350_v63  ;;  %v490_v4 = vmul.f32 %v350_v63, %v350_v63  ;;  %v520_v5 = vadd.f32 %v519_v58, %v489_v56  ;;  %v506_v51 = vmul.f32 %v430_v0, %v430_v0 }
 0x166   : > { %v453_v7 = vadd.f32 %v741_v59, %v452_v2  ;;  %v521_v8 = vadd.f32 %v520_v5, %v490_v4 }
 0x168   : > { %v522_v11 = vadd.f32 %v521_v8, %v491_v6  ;;  %v454_v13 = vadd.f32 %v453_v7, %v1190_v60  ;;  %v496_v60 = vmul.f32 %v1198_v12, %v1198_v12 }
 0x16a   : > { %v523_v15 = vadd.f32 %v522_v11, %v492_v9  ;;  %v455_v16 = vadd.f32 %v1188_v57, %v454_v13  ;;  %v497_v57 = vmul.f32 %v1196_v10, %v1196_v10 }
 0x16c   : > { %v456_v18 = vadd.f32 %v455_v16, %v1194_v3  ;;  %v524_v19 = vadd.f32 %v523_v15, %v493_v14  ;;  %v498_v3 = vmul.f32 %v1202_v22, %v1202_v22 }
 0x16e   : > { %v525_v23 = vadd.f32 %v524_v19, %v494_v17  ;;  %v457_v24 = vadd.f32 %v1192_v1, %v456_v18  ;;  %v499_v1 = vmul.f32 %v1200_v20, %v1200_v20 }
 0x170   : > { %v458_v25 = vadd.f32 %v457_v24, %v1198_v12  ;;  %v526_v26 = vadd.f32 %v525_v23, %v495_v21  ;;  %v500_v12 = vmul.f32 %v400_v32, %v400_v32 }
 0x172   : > { %v527_v27 = vadd.f32 %v526_v26, %v496_v60  ;;  %v459_v28 = vadd.f32 %v1196_v10, %v458_v25 }
 0x174   : > { %v460_v29 = vadd.f32 %v459_v28, %v1202_v22  ;;  %v528_v31 = vadd.f32 %v527_v27, %v497_v57  ;;  %v503_v22 = vmul.f32 %v1206_v40, %v1206_v40 }
 0x176   : > { %v529_v33 = vadd.f32 %v528_v31, %v498_v3  ;;  %v461_v34 = vadd.f32 %v1200_v20, %v460_v29 }
 0x178   : > { %v462_v35 = vadd.f32 %v461_v34, %v400_v32  ;;  %v530_v36 = vadd.f32 %v529_v33, %v499_v1  ;;  %v505_v32 = vmul.f32 %v762_v50, %v762_v50 }
 0x17a   : > { %v531_v38 = vadd.f32 %v530_v36, %v500_v12  ;;  %v463_v10 = vadd.f32 %v1204_v30, %v462_v35 }
 0x17c   : > { %v464_v41 = vadd.f32 %v463_v10, %v410_v42  ;;  %v532_v43 = vadd.f32 %v531_v38, %v501_v37 }
 0x17e   : > { %v533_v44 = vadd.f32 %v532_v43, %v502_v39  ;;  %v465_v45 = vadd.f32 %v1206_v40, %v464_v41 }
 0x180   : > { %v466_v20 = vadd.f32 %v465_v45, %v420_v52  ;;  %v534_v47 = vadd.f32 %v533_v44, %v503_v22 }
 0x182   : > { %v535_v48 = vadd.f32 %v534_v47, %v504_v46  ;;  %v467_v49 = vadd.f32 %v762_v50, %v466_v20 }
 0x184   : > { %v468_v53 = vadd.f32 %v467_v49, %v430_v0  ;;  %v536_v54 = vadd.f32 %v535_v48, %v505_v32 }
 0x186   : > { %v469_v30 = vadd.f32 %v765_v62, %v468_v53  ;;  %v537_v56 = vadd.f32 %v536_v54, %v506_v51  ;;  %v1006_v62 = vmov (!%p1290_p7), 0.0  }
 0x187   : > { %551 = vst [vmem:[#allocation7] sm:$0x3] (!%p1290_p7), %v1006_v62 }
 0x188   : > { %v470_v42 = vrot.slane %v469_v30, 4  ;;  %v538_v58 = vadd.f32 %v537_v56, %v507_v55 }
 0x18a   : > { %v471_v59 = vadd.f32 %v470_v42, %v469_v30  ;;  %v539_v61 = vrot.slane %v538_v58, 4 }
 0x18c   : > { %v472_v63 = vrot.slane %v471_v59, 2  ;;  %v540_v2 = vadd.f32 %v539_v61, %v538_v58 }
 0x18e   : > { %v473_v4 = vadd.f32 %v472_v63, %v471_v59  ;;  %v541_v40 = vrot.slane %v540_v2, 2 }
 0x190   : > { %v474_v5 = vrot.slane %v473_v4, 1  ;;  %v542_v52 = vadd.f32 %v541_v40, %v540_v2  ;;  %550 = sbr.rel (%p1290_p7) target bundleno = 407 (0x197), region = 40 }
 0x192   : > { %v543_v6 = vrot.slane %v542_v52, 1  ;;  %v475_v7 = vadd.f32 %v474_v5, %v473_v4 }
 0x194   : > { %v544_v50 = vadd.f32 %v543_v6, %v542_v52 }
 0x196   : > { %v546_v8 = vsel %vm545_vm0, %v475_v7, %v544_v50 }
 0x197 PF: > { %v552_v0 = vld [vmem:[#allocation7] sm:$0x3]  ;;  %p835_p1 = scmp.eq.s32.totalorder %s1042_s13, 3  ;;  %s1007_s14 = smov [#allocation7]  }
 0x198   : > { %v553_v9 = vadd.f32 %v552_v0, %v546_v8  ;;  %s562_s15 = sshll.u32 %s1007_s14, 4  ;;  %s563_s15 = int_to_ptr.vmem [resolvable:$true] %s562_s15 }
 0x199   : > { %s932_s30 = scalar_lea.vmem %s563_s15, 32  ;;  %p939_p9 = scmp.lt.s32.totalorder %s563_s15, %s563_s15 }
 0x19a   : > { %554 = vst [vmem:[#allocation7] sm:$0x3] %v553_v9  ;;  %p933_p4 = scmp.ne.s32.totalorder %s563_s15, %s932_s30  ;;  %p940_p10 = scmp.lt.s32.totalorder %s932_s30, %s932_s30 }
 0x19c   : > { %p934_p5 = pnand %p933_p4, %p835_p1  ;;  %p941_p12 = por %p940_p10, %p939_p9 }
 0x19e   : > { %p935_p6 = pneg %p934_p5 }
 0x1a0   : > { %p942_p0 = pnand %p941_p12, %p935_p6 }
 0x1a2   : > { %945 = shalt.err (!%p942_p0)
}
 0x1a3   : > { %s946_s17 = scalar_lea.hbm %s1278_s2, 32 }
 0x1a4   : > { %p947_p2 = scmp.ne.s32.totalorder %s1278_s2, %s946_s17  ;;  %p952_p3 = scmp.lt.u32.totalorder %s946_s17, %s1278_s2 }
 0x1a6   : > { %p948_p11 = pnand %p947_p2, %p835_p1 }
 0x1a8   : > { %p949_p13 = pneg %p948_p11 }
 0x1aa   : > { %p954_p8 = pnand %p952_p3, %p949_p13 }
 0x1ac   : > { %957 = shalt.err (!%p954_p8)
}
 0x1ad   : > { %821 = dma.vmem_to_hbm [thread:$0]  (%p835_p1), %s563_s15, 32, %s1278_s2, [#allocation4]  }
 0x1ae   : > { %983 = dma.done.wait (%p835_p1), [#allocation4], 32  }
 0x1af   : > { %985 = vsyncadd (%p835_p1), [#allocation4], 4294967264 }
 0x1b0 PF: > { %p14_p7 = scmp.ge.s32.totalorder %s1068_s19, 6   ;;  %s1291_s9 = smov %s992_s10 }
 0x1b1   : > { %s1292_s10 = smov %s996_s11  ;;  %s1293_s11 = smov %s1097_s6 }
 0x1b2   : > { %s1294_s12 = smov %s1068_s19  ;;  %16 = sbr.rel (!%p14_p7) target bundleno = 5 (0x5), region = 73 }
 0x1b9   :  { %575 = vsyncpa [#allocation3], 1 }
 0x1ba   :  { %577 = vsyncpa [#allocation3 + $0x1], 1 }
 0x1bb   :  { %578 = vsyncpa [#allocation6], 1 }
 0x1bc   :  { %579 = vsyncpa [#allocation4], 1 }
 0x1bd   :  { %581 = vsyncpa [#allocation4 + $0x1], 1 }

</bundles_post_ra>
